<compile_context>
chip_gen: v6e
topology: v6e:2x2x1
jax: 0.10.0
libtpu: 0.0.40
codegen_flags: <defaults>
</compile_context>

<pallas_src>
import jax
import jax.numpy as jnp
from jax.experimental import pallas as pl
from jax.experimental.pallas import tpu as pltpu

EMBED_DIM = 128    # embed_dim
NODES = 40         # self.nodes
NODES_PAD = 128    # nodes padded to a full 128-lane vreg


def _round_up(x, m):
    return ((x + m - 1) // m) * m


def head_kernel(x_ref, wfc_ref, bfc_ref, wout_ref, bout_ref, o_ref):
    # x:    [TILE_B, 128] (bf16 or f32)   wfc:  [128, 128] (bf16 or f32, node-padded)
    # bfc:  [1, 128] f32 (pad lanes = 0)  wout: [1, 128] f32 (pad lanes = 0)
    # bout: SMEM f32[1]                   o:    [TILE_B, 1] f32
    #
    # o_linear = fc(x)  -- MXU matmul, f32 accumulation
    h = jnp.dot(x_ref[...], wfc_ref[...], preferred_element_type=jnp.float32)
    # o_relu = relu(o_linear + b_fc)  -- f32 on the VPU (full-width vregs, no lane masks)
    h = jnp.maximum(h + bfc_ref[...].astype(jnp.float32), 0.0)
    # o_dropout = dropout3(o_relu)  -- eval mode: identity
    # o = output(o_dropout): out_features == 1 -> broadcast multiply + lane
    # reduction (VPU/XLU free slots) rather than an N=1 MXU matmul.
    o = jnp.sum(h * wout_ref[...].astype(jnp.float32), axis=-1, keepdims=True)
    o_ref[...] = (o + bout_ref[0]).astype(o_ref.dtype)


def _pad_nodes(a, axis):
    """Zero-pad the node axis of a (tiny) weight/bias array to NODES_PAD lanes."""
    n = a.shape[axis]
    if n == NODES_PAD:
        return a
    pad = [(0, 0)] * a.ndim
    pad[axis] = (0, NODES_PAD - n)
    return jnp.pad(a, pad)


def cnn_linear_head(x, w_fc, b_fc, w_out_row, b_out, *, tile_b=4096):
    """Fused fc -> relu -> output head.

    x:         [B, EMBED_DIM]        f32 or (preferred) bf16 -- bf16 halves the
                                     dominant HBM read; cast at the producer.
    w_fc:      [EMBED_DIM, NODES]    pre-transposed fc weight (f32 or bf16)
    b_fc:      [1, NODES]            f32
    w_out_row: [1, NODES]            f32 (output-layer weight, natural row layout)
    b_out:     [1]                   f32 (scalar, placed in SMEM)
    returns    [B, 1]                f32
    """
    B, E = x.shape

    # Pad the node axis of the (tiny) weights to a full 128-lane vreg.
    # Padded b_fc / w_out lanes are 0 -> relu(0) * 0 contributes nothing.
    w_fc_p = _pad_nodes(w_fc, 1)
    b_fc_p = _pad_nodes(b_fc, 1)
    w_out_p = _pad_nodes(w_out_row, 1)
    NP = NODES_PAD

    # Batch tile: multiple of 16 sublanes (bf16 min tile), capped so that the
    # grid has >= 2 steps whenever B allows it (v7x dual-TC sharding), and no
    # larger than the (16-rounded) batch.
    tb = _round_up(max(tile_b, 16), 16)
    half = _round_up(max(pl.cdiv(B, 2), 1), 16)   # aim for >= 2 grid steps
    tb = max(16, min(tb, half, _round_up(B, 16)))

    grid = (pl.cdiv(B, tb),)   # ragged last block handled by Pallas (no jnp.pad of x)

    x_bytes = jnp.dtype(x.dtype).itemsize
    w_bytes = jnp.dtype(w_fc_p.dtype).itemsize
    cost = pl.CostEstimate(
        flops=2 * B * E * NP + 2 * B * NP,
        transcendentals=0,
        bytes_accessed=B * E * x_bytes + B * 4 + E * NP * w_bytes + 2 * NP * 4 + 4,
    )

    out = pl.pallas_call(
        head_kernel,
        out_shape=jax.ShapeDtypeStruct((B, 1), jnp.float32),
        grid=grid,
        in_specs=[
            pl.BlockSpec((tb, E), lambda i: (i, 0)),            # x: streamed tiles
            pl.BlockSpec((E, NP), lambda i: (0, 0)),            # w_fc: resident
            pl.BlockSpec((1, NP), lambda i: (0, 0)),            # b_fc: resident
            pl.BlockSpec((1, NP), lambda i: (0, 0)),            # w_out: resident
            pl.BlockSpec(memory_space=pltpu.MemorySpace.SMEM),  # b_out: scalar
        ],
        out_specs=pl.BlockSpec((tb, 1), lambda i: (i, 0)),
        compiler_params=pltpu.CompilerParams(
            dimension_semantics=("parallel",)),
        cost_estimate=cost,
    )(x, w_fc_p, b_fc_p, w_out_p, b_out)
    return out


def init_params(key):
    """Deterministic init mimicking nn.Linear (uniform +-1/sqrt(fan_in))."""
    k1, k2, k3, k4 = jax.random.split(key, 4)
    lim_fc = 1.0 / jnp.sqrt(EMBED_DIM)
    lim_out = 1.0 / jnp.sqrt(NODES)
    # fc weight stored transposed: [in, out]; output weight kept as its
    # natural [1, NODES] row (out_features == 1).
    w_fc = jax.random.uniform(k1, (EMBED_DIM, NODES), jnp.float32, -lim_fc, lim_fc)
    b_fc = jax.random.uniform(k2, (1, NODES), jnp.float32, -lim_fc, lim_fc)
    w_out_row = jax.random.uniform(k3, (1, NODES), jnp.float32, -lim_out, lim_out)
    b_out = jax.random.uniform(k4, (1,), jnp.float32, -lim_out, lim_out)
    return w_fc, b_fc, w_out_row, b_out


def ref_head(x, w_fc, b_fc, w_out_row, b_out):
    """Pure-JAX f32 reference for the fused head."""
    xf = x.astype(jnp.float32)
    h = jnp.maximum(xf @ w_fc.astype(jnp.float32) + b_fc, 0.0)
    return h @ w_out_row.astype(jnp.float32).T + b_out


if __name__ == "__main__":
    key = jax.random.PRNGKey(0)
    kx1, kx2, kp = jax.random.split(key, 3)

    w_fc, b_fc, w_out_row, b_out = init_params(kp)

    # --- Test 1: small f32 batch; default tile -> tb=16, 2 grid steps. ---
    B1 = 32
    x1 = jax.random.normal(kx1, (B1, EMBED_DIM), dtype=jnp.float32)
    out1 = jax.block_until_ready(cnn_linear_head(x1, w_fc, b_fc, w_out_row, b_out))
    ref1 = ref_head(x1, w_fc, b_fc, w_out_row, b_out)
    assert out1.shape == (B1, 1)
    assert jnp.allclose(out1, ref1, atol=1e-5, rtol=1e-5)

    # --- Test 2: multi-tile pipelined path, bf16 inputs, ragged last block. ---
    B2 = 300   # not a multiple of the tile -> exercises the ragged (unpadded) path
    x2 = jax.random.normal(kx2, (B2, EMBED_DIM), dtype=jnp.float32).astype(jnp.bfloat16)
    w_fc_bf16 = w_fc.astype(jnp.bfloat16)
    out2 = jax.block_until_ready(
        cnn_linear_head(x2, w_fc_bf16, b_fc, w_out_row, b_out, tile_b=128))
    ref2 = ref_head(x2, w_fc, b_fc, w_out_row, b_out)   # f32 reference
    assert out2.shape == (B2, 1)
    assert jnp.allclose(out2, ref2, atol=5e-2, rtol=5e-2)

    print("KERNEL_OK")
</pallas_src>

<mosaic_0001>
module attributes {stable_mosaic.version = 11 : i64} {
  func.func @head_kernel(%arg0: i32, %arg1: memref<16x128xf32, #tpu.memory_space<vmem>>, %arg2: memref<128x128xf32, #tpu.memory_space<vmem>>, %arg3: memref<1x128xf32, #tpu.memory_space<vmem>>, %arg4: memref<1x128xf32, #tpu.memory_space<vmem>>, %arg5: memref<1xf32, #tpu.memory_space<smem>>, %arg6: memref<16x1xf32, #tpu.memory_space<vmem>>) attributes {dimension_semantics = [#tpu.dimension_semantics<parallel>], iteration_bounds = array<i64: 2>, scalar_prefetch = 0 : i64, scratch_operands = 0 : i64, tpu.core_type = #tpu.core_type<tc>, window_params = [{transform_indices = @transform_0, window_bounds = array<i64: 16, 128>}, {pipeline_mode = #tpu.pipeline_mode<synchronous>, transform_indices = @transform_1, window_bounds = array<i64: 128, 128>}, {pipeline_mode = #tpu.pipeline_mode<synchronous>, transform_indices = @transform_2, window_bounds = array<i64: 1, 128>}, {pipeline_mode = #tpu.pipeline_mode<synchronous>, transform_indices = @transform_3, window_bounds = array<i64: 1, 128>}, {transform_indices = @transform_4, window_bounds = array<i64: 1>}, {transform_indices = @transform_5, window_bounds = array<i64: 16, 1>}]} {
    %c0 = arith.constant 0 : index
    %c0_0 = arith.constant 0 : index
    %0 = vector.load %arg1[%c0, %c0_0] : memref<16x128xf32, #tpu.memory_space<vmem>>, vector<16x128xf32>
    %c0_1 = arith.constant 0 : index
    %c0_2 = arith.constant 0 : index
    %1 = vector.load %arg2[%c0_1, %c0_2] : memref<128x128xf32, #tpu.memory_space<vmem>>, vector<128x128xf32>
    %cst = arith.constant dense<0.000000e+00> : vector<16x128xf32>
    %2 = tpu.matmul %0, %1, %cst {dimension_numbers = #tpu.dot_dimension_numbers<[1], [0], [0], [1], [0, 0, 1, 1], [], []>} : vector<16x128xf32>, vector<128x128xf32>, vector<16x128xf32> -> vector<16x128xf32>
    %c0_3 = arith.constant 0 : index
    %c0_4 = arith.constant 0 : index
    %3 = vector.load %arg3[%c0_3, %c0_4] : memref<1x128xf32, #tpu.memory_space<vmem>>, vector<1x128xf32>
    %4 = vector.broadcast %3 : vector<1x128xf32> to vector<16x128xf32>
    %5 = arith.addf %2, %4 : vector<16x128xf32>
    %cst_5 = arith.constant 0.000000e+00 : f32
    %6 = vector.broadcast %cst_5 : f32 to vector<16x128xf32>
    %7 = arith.maximumf %5, %6 : vector<16x128xf32>
    %c0_6 = arith.constant 0 : index
    %c0_7 = arith.constant 0 : index
    %8 = vector.load %arg4[%c0_6, %c0_7] : memref<1x128xf32, #tpu.memory_space<vmem>>, vector<1x128xf32>
    %9 = vector.broadcast %8 : vector<1x128xf32> to vector<16x128xf32>
    %10 = arith.mulf %7, %9 : vector<16x128xf32>
    %cst_8 = arith.constant dense<0.000000e+00> : vector<16xf32>
    %11 = vector.multi_reduction <add>, %10, %cst_8 [1] : vector<16x128xf32> to vector<16xf32>
    %12 = vector.shape_cast %11 : vector<16xf32> to vector<16x1xf32>
    %c0_9 = arith.constant 0 : index
    %13 = memref.load %arg5[%c0_9] : memref<1xf32, #tpu.memory_space<smem>>
    %14 = vector.broadcast %13 : f32 to vector<16x1xf32>
    %15 = arith.addf %12, %14 : vector<16x1xf32>
    %c0_10 = arith.constant 0 : index
    %c0_11 = arith.constant 0 : index
    %16 = vector.load %arg6[%c0_10, %c0_11] : memref<16x1xf32, #tpu.memory_space<vmem>>, vector<16x1xf32>
    tpu.vector_store %arg6[%c0_10, %c0_11], %15 {strides = array<i32>} : memref<16x1xf32, #tpu.memory_space<vmem>>, vector<16x1xf32>,
    return
  }
  func.func @transform_0(%arg0: i32) -> (i32, i32) {
    %c0_i32 = arith.constant 0 : i32
    %c0_i32_0 = arith.constant 0 : i32
    return %arg0, %c0_i32 : i32, i32
  }
  func.func @transform_1(%arg0: i32) -> (i32, i32) {
    %c0_i32 = arith.constant 0 : i32
    %c0_i32_0 = arith.constant 0 : i32
    %c0_i32_1 = arith.constant 0 : i32
    return %c0_i32, %c0_i32_0 : i32, i32
  }
  func.func @transform_2(%arg0: i32) -> (i32, i32) {
    %c0_i32 = arith.constant 0 : i32
    %c0_i32_0 = arith.constant 0 : i32
    %c0_i32_1 = arith.constant 0 : i32
    return %c0_i32, %c0_i32_0 : i32, i32
  }
  func.func @transform_3(%arg0: i32) -> (i32, i32) {
    %c0_i32 = arith.constant 0 : i32
    %c0_i32_0 = arith.constant 0 : i32
    %c0_i32_1 = arith.constant 0 : i32
    return %c0_i32, %c0_i32_0 : i32, i32
  }
  func.func @transform_4(%arg0: i32) -> i32 {
    %c0_i32 = arith.constant 0 : i32
    %c0_i32_0 = arith.constant 0 : i32
    return %c0_i32 : i32
  }
  func.func @transform_5(%arg0: i32) -> (i32, i32) {
    %c0_i32 = arith.constant 0 : i32
    %c0_i32_0 = arith.constant 0 : i32
    return %arg0, %c0_i32 : i32, i32
  }
}

</mosaic_0001>

<bundles_post_ra>
// kernel: tpu_custom_call.1
= control target key start
LH: loop header
LB: loop body
LE: loop exit
PB: predicated region body
PF: predicated region fallthrough
CT: control target
= control target key end

     0   :  { %s864_s0 = inlined_call_operand.hbm [shape: f32[32,128], index: 0, kind: input, shape index: {}]   ;;  %s865_s1 = inlined_call_operand.hbm [shape: f32[128,128], index: 1, kind: input, shape index: {}]   ;;  %s866_s2 = inlined_call_operand.vmem [shape: f32[1,128], index: 2, kind: input, shape index: {}]   ;;  %s867_s3 = inlined_call_operand.vmem [shape: f32[1,128], index: 3, kind: input, shape index: {}]   ;;  %s868_s4 = inlined_call_operand.<no memory space> [shape: f32[1], index: 4, kind: input, shape index: {}]   ;;  %s869_s5 = inlined_call_operand.vmem [shape: f32[32,1], index: 5, kind: output, shape index: {}]  }
   0x1   :  { %10 = sst [smem:[#allocation2]] %s868_s4 }
   0x2   :  { %11 = vsyncpa [#allocation4], 0 }
   0x3   :  { %13 = vsyncpa [#allocation4 + $0x1], 0 }
   0x4   :  { %14 = vsyncpa [#allocation6], 0  ;;  %s716_s20 = smov 0   ;;  %s718_s21 = smov 0  }
   0x5   :  { %s720_s22 = smov 0   ;;  %s722_s23 = smov 0  }
   0x6 LB: > { %s462_s4 = sadd.s32 4294967295, %s677_s23   ;;  %p40_p0 = scmp.ne.s32.totalorder %s669_s21, %s665_s20  ;;  %s677_s23 = sphi %s722_s23, %s885_s23   ;;  %s673_s22 = sphi %s720_s22, %s884_s22   ;;  %s669_s21 = sphi %s718_s21, %s883_s21   ;;  %s665_s20 = sphi %s716_s20, %s882_s20  }
   0x7   : > { %p738_p1 = scmp.eq.s32.totalorder %s462_s4, 0  ;;  %p464_p2 = scmp.ge.s32.totalorder %s677_s23, 1 }
   0x8   : > { %p161_p3 = scmp.lt.s32.totalorder %s677_s23, 3  ;;  %s679_s27 = smov [#allocation5]  }
   0x9   : > { %s874_s24 = scalar_select %p738_p1, 1, 0 }
   0xa   : > { %p746_p4 = por %p738_p1, %p40_p0  ;;  %p750_p5 = pnand %p464_p2, %p161_p3 }
   0xb   : > { %s173_s28 = sshll.u32 %s679_s27, 4  ;;  %s763_s30 = sadd.s32 1, %s677_s23   ;;  %s174_s28 = int_to_ptr.vmem [resolvable:$true] %s173_s28 }
   0xc   : > { %s875_s25 = scalar_select %p746_p4, 1, 0 }
   0xd   : > { %s876_s26 = scalar_select %p750_p5, 1, 0 }
   0xe   : > { %p539_p6 = pneg %p750_p5  ;;  %s27_s6 = sadd.s32 1, %s673_s22 }
   0xf   : > { %s24_s7 = ssub.s32 %s677_s23, %s763_s30  ;;  %s596_s8 = scalar_lea.vmem %s174_s28, 2048 }
  0x10   : > { %p758_p7 = pnand %p539_p6, %p738_p1  ;;  %p597_p9 = scmp.ne.s32.totalorder %s174_s28, %s596_s8 }
  0x11   : > { %p604_p12 = scmp.lt.s32.totalorder %s174_s28, %s174_s28  ;;  %p605_p13 = scmp.lt.s32.totalorder %s596_s8, %s596_s8 }
  0x12   : > { %p587_p8 = pneg %p758_p7 }
  0x13   : > { %p606_p0 = por %p605_p13, %p604_p12 }
  0x14   : > { %p599_p10 = pnand %p597_p9, %p587_p8 }
  0x16   : > { %p600_p11 = pneg %p599_p10 }
  0x18   : > { %p607_p2 = pnand %p606_p0, %p600_p11 }
  0x1a   : > { %610 = shalt.err (!%p607_p2)
}
  0x1b   : > { %s680_s9 = smov 128   ;;  %s681_s10 = smov 8  }
  0x1c   : > { %542 = dma.hbm_to_vmem [thread:$0]  (!%p758_p7), %s865_s1, 2048, %s174_s28, [#allocation6], %s680_s9, %s680_s9, %s681_s10  }
  0x1d   : > { %p25_p3 = scmp.eq.s32.totalorder %s24_s7, 0  ;;  %p34_p6 = scmp.ne.s32.totalorder %s673_s22, %s669_s21 }
  0x1e   : > { %p35_p8 = scmp.eq.s32.totalorder %s677_s23, 0  ;;  %p548_p9 = scmp.lt.s32.totalorder %s677_s23, 2 }
  0x1f   : > { %s783_s13 = scalar_select %p25_p3, %s673_s22, %s27_s6  }
  0x20   : > { %p36_p10 = por %p35_p8, %p34_p6  ;;  %s196_s14 = sand.u32 1, %s673_s22  }
  0x21   : > { %s467_s15 = sshll.u32 %s196_s14, 4  ;;  %s479_s16 = sshll.u32 %s677_s23, 8 }
  0x22   : > { %s790_s19 = scalar_lea.hbm %s864_s0, %s479_s16  ;;  %s200_s20 = scalar_lea.vmem [#allocation3], %s467_s15 }
  0x23   : > { %s207_s27 = sshll.u32 %s200_s20, 4  ;;  %p794_p7 = pnand %p548_p9, %p36_p10  ;;  %s792_s27 = int_to_ptr.vmem [resolvable:$true] %s207_s27 }
  0x24   : > { %s798_s29 = scalar_lea.sflag [#allocation4], %s196_s14  ;;  %s611_s6 = scalar_lea.hbm %s790_s19, 256 }
  0x25   : > { %p612_p11 = scmp.ne.s32.totalorder %s790_s19, %s611_s6  ;;  %p613_p12 = pneg %p794_p7 }
  0x26   : > { %s616_s11 = scalar_lea.hbm %s864_s0, 512  ;;  %p617_p2 = scmp.lt.s32.totalorder %s790_s19, %s864_s0 }
  0x27   : > { %p614_p13 = pnand %p613_p12, %p612_p11  ;;  %p618_p3 = scmp.lt.s32.totalorder %s616_s11, %s611_s6 }
  0x29   : > { %p615_p0 = pneg %p614_p13  ;;  %p619_p6 = por %p618_p3, %p617_p2 }
  0x2b   : > { %p620_p8 = pnand %p619_p6, %p615_p0 }
  0x2d   : > { %623 = shalt.err (!%p620_p8)
}
  0x2e   : > { %s624_s14 = scalar_lea.vmem %s792_s27, 256  ;;  %s682_s16 = smov [#allocation3]  }
  0x2f   : > { %p625_p9 = scmp.ne.s32.totalorder %s792_s27, %s624_s14  ;;  %s629_s17 = sshll.u32 %s682_s16, 4  ;;  %s630_s17 = int_to_ptr.vmem [resolvable:$false] %s629_s17 }
  0x30   : > { %s631_s18 = scalar_lea.vmem %s630_s17, 512  ;;  %p632_p13 = scmp.lt.s32.totalorder %s792_s27, %s630_s17 }
  0x31   : > { %p627_p10 = pnand %p625_p9, %p613_p12  ;;  %p633_p1 = scmp.lt.s32.totalorder %s631_s18, %s624_s14 }
  0x33   : > { %p628_p11 = pneg %p627_p10  ;;  %p634_p4 = por %p633_p1, %p632_p13 }
  0x35   : > { %p635_p5 = pnand %p634_p4, %p628_p11 }
  0x37   : > { %638 = shalt.err (!%p635_p5)
}
  0x38   : > { %546 = dma.hbm_to_vmem [thread:$0]  (!%p794_p7), %s790_s19, 256, %s792_s27, %s798_s29, %s680_s9, %s680_s9, %s681_s10  }
  0x39   : > { %p879_p12 = scmp.ne.s32.totalorder %s876_s26, 0 }
  0x3a   : > { %s221_s20 = sand.u32 (!%p879_p12), 1, %s669_s21   ;;  %p880_p1 = scmp.ne.s32.totalorder (!%p879_p12), %s875_s25, 0 }
  0x3b   : > { %219 = sbr.rel (%p879_p12) target bundleno = 447 (0x1bf), region = 40  ;;  %s825_s6 = sshll.u32 (!%p879_p12), %s221_s20, 4 }
  0x3c   : > { %s222_s7 = scalar_lea.sflag (!%p879_p12), [#allocation4], %s221_s20  ;;  %s225_s8 = scalar_lea.vmem (!%p879_p12), [#allocation3], %s825_s6 }
  0x40   : > { %656 = dma.done.wait (%p880_p1), %s222_s7, 256  }
  0x41   : > { %658 = vsyncadd (%p880_p1), %s222_s7, 4294967040  ;;  %p881_p4 = scmp.ne.s32.totalorder %s874_s24, 0 }
  0x43   : > { %660 = dma.done.wait (%p881_p4), [#allocation6], 2048  }
  0x44   : > { %662 = vsyncadd (%p881_p4), [#allocation6], 4294965248  ;;  %v280_v0 = vld [vmem:[#allocation5 + $0x78] sm:$0xff]  ;;  %v279_v1 = vld [vmem:[#allocation5 + $0x70] sm:$0xff]  ;;  %s473_s10 = sshll.u32 %s462_s4, 1  ;;  %s378_s19 = sld [smem:[#allocation2]] }
  0x45   : > { %498 = vmatprep.subr.mxu0 %v280_v0  ;;  %v278_v2 = vld [vmem:[#allocation5 + $0x68] sm:$0xff]  ;;  %v277_v3 = vld [vmem:[#allocation5 + $0x60] sm:$0xff]  ;;  %v276_v5 = vld [vmem:[#allocation5 + $0x58] sm:$0xff]  ;;  %p258_p5 = scmp.lt.s32.totalorder %s473_s10, 3  ;;  %vm382_vm0 = vcmask 7168  }
  0x46   : > { %499 = vmatpush3.msra.mxu0 %v280_v0  ;;  %v263_v4 = vld [vmem:[%s225_s8] sm:$0xff]  ;;  %v274_v7 = vld [vmem:[#allocation5 + $0x48] sm:$0xff]  ;;  %v272_v9 = vld [vmem:[#allocation5 + $0x38] sm:$0xff] }
  0x47   : > { %500 = vmatprep.subr.mxu0 %v279_v1  ;;  %530 = vmatprep.mubr.f32.mxu0 %v263_v4  ;;  %v275_v6 = vld [vmem:[#allocation5 + $0x50] sm:$0xff]  ;;  %v273_v8 = vld [vmem:[#allocation5 + $0x40] sm:$0xff]  ;;  %v270_v11 = vld [vmem:[#allocation5 + $0x28] sm:$0xff]  ;;  %s887_s10 = smov (!%p258_p5, %s473_s10), 3 }
  0x48   : > { %501 = vmatpush3.msra.mxu0 %v279_v1  ;;  %v271_v10 = vld [vmem:[#allocation5 + $0x30] sm:$0xff]  ;;  %v269_v12 = vld [vmem:[#allocation5 + $0x20] sm:$0xff]  ;;  %v268_v13 = vld [vmem:[#allocation5 + $0x18] sm:$0xff]  ;;  %s474_s27 = sshll.u32 %s887_s10, 3 }
  0x49   : > { %502 = vmatprep.subr.mxu0 %v278_v2  ;;  %v267_v14 = vld [vmem:[#allocation5 + $0x10] sm:$0xff]  ;;  %v266_v15 = vld [vmem:[#allocation5 + $0x8] sm:$0xff]  ;;  %v265_v16 = vld [vmem:[#allocation5] sm:$0xff]  ;;  %s261_s11 = scalar_lea.vmem %s869_s5, %s474_s27 }
  0x4a   : > { %503 = vmatpush3.msra.mxu0 %v278_v2  ;;  %v264_v17 = vld [vmem:[%s225_s8 + $0x8] sm:$0xff]  ;;  %v475_v19 = vld [vmem:[%s866_s2] ss:$0 sm:$0xff]  ;;  %v379_v28 = vstv %s378_s19 }
  0x4b   : > { %504 = vmatprep.subr.mxu0 %v277_v3  ;;  %v476_v24 = vld [vmem:[%s867_s3] ss:$0 sm:$0xff] }
  0x4c   : > { %505 = vmatpush3.msra.mxu0 %v277_v3 }
  0x4d   : > { %506 = vmatprep.subr.mxu0 %v276_v5 }
  0x4e   : > { %507 = vmatpush3.msra.mxu0 %v276_v5 }
  0x4f   : > { %508 = vmatprep.subr.mxu0 %v275_v6 }
  0x50   : > { %509 = vmatpush3.msra.mxu0 %v275_v6 }
  0x51   : > { %510 = vmatprep.subr.mxu0 %v274_v7 }
  0x52   : > { %511 = vmatpush3.msra.mxu0 %v274_v7 }
  0x53   : > { %512 = vmatprep.subr.mxu0 %v273_v8 }
  0x54   : > { %513 = vmatpush3.msra.mxu0 %v273_v8 }
  0x55   : > { %514 = vmatprep.subr.mxu0 %v272_v9 }
  0x56   : > { %515 = vmatpush3.msra.mxu0 %v272_v9 }
  0x57   : > { %516 = vmatprep.subr.mxu0 %v271_v10 }
  0x58   : > { %517 = vmatpush3.msra.mxu0 %v271_v10 }
  0x59   : > { %518 = vmatprep.subr.mxu0 %v270_v11 }
  0x5a   : > { %519 = vmatpush3.msra.mxu0 %v270_v11 }
  0x5b   : > { %520 = vmatprep.subr.mxu0 %v269_v12 }
  0x5c   : > { %521 = vmatpush3.msra.mxu0 %v269_v12 }
  0x5d   : > { %522 = vmatprep.subr.mxu0 %v268_v13 }
  0x5e   : > { %523 = vmatpush3.msra.mxu0 %v268_v13 }
  0x5f   : > { %524 = vmatprep.subr.mxu0 %v267_v14 }
  0x60   : > { %525 = vmatpush3.msra.mxu0 %v267_v14 }
  0x61   : > { %526 = vmatprep.subr.mxu0 %v266_v15 }
  0x62   : > { %527 = vmatpush3.msra.mxu0 %v266_v15 }
  0x63   : > { %528 = vmatprep.subr.mxu0 %v265_v16 }
  0x64   : > { %529 = vmatpush3.msra.mxu0 %v265_v16 }
  0x65   : > { %531 = vmatmul.mubr.f32.vlgmr.msra.gmra.mxu0 %v264_v17 }
 0x125   : > { %v532_v18 = vpop.f32.mrf.mxu0 }
 0x126   : > { %v360_v21 = vadd.f32 %v532_v18, %v475_v19 }
 0x127   : > { %v354_v20 = vpop.f32.mrf.mxu0 }
 0x128   : > { %v355_v22 = vadd.f32 %v475_v19, %v354_v20  ;;  %v364_v25 = vmax.f32 %v360_v21, 0.0 }
 0x12a   : > { %v363_v23 = vmax.f32 %v355_v22, 0.0  ;;  %v373_v27 = vmul.f32 %v476_v24, %v364_v25 }
 0x12c   : > { %v372_v26 = vmul.f32 %v476_v24, %v363_v23 }
 0x12e   : > { %374 = vadd.xlane.f32.xlu0 %v372_v26 }
 0x132   : > { %376 = vadd.xlane.f32.xlu0 %v373_v27 }
 0x1b7   : > { %v375_v29 = vpop.xlane.xlu0 %374 }
 0x1b8   : > { %v380_v30 = vadd.f32 %v379_v28, %v375_v29 }
 0x1ba   : > { %383 = vst.msk [vmem:[%s261_s11] sm:$0xff] %vm382_vm0, %v380_v30 }
 0x1bb   : > { %v377_v31 = vpop.xlane.xlu0 %376 }
 0x1bc   : > { %v381_v32 = vadd.f32 %v379_v28, %v377_v31 }
 0x1be   : > { %384 = vst.msk [vmem:[%s261_s11 + $0x8] sm:$0xff] %vm382_vm0, %v381_v32 }
 0x1bf PF: > { %p17_p7 = scmp.ge.s32.totalorder %s763_s30, 4   ;;  %s882_s20 = smov %s669_s21 }
 0x1c0   : > { %s883_s21 = smov %s673_s22  ;;  %s884_s22 = smov %s783_s13 }
 0x1c1   : > { %s885_s23 = smov %s763_s30  ;;  %19 = sbr.rel (!%p17_p7) target bundleno = 6 (0x6), region = 84 }
 0x1c6   :  { %407 = vsyncpa [#allocation4], 1 }
 0x1c7   :  { %409 = vsyncpa [#allocation4 + $0x1], 1 }
 0x1c8   :  { %410 = vsyncpa [#allocation6], 1 }

</bundles_post_ra>
